<compile_context>
chip_gen: v7x
topology: tpu7x:2x2x1
jax: 0.10.0
libtpu: 0.0.40
codegen_flags: <defaults>
</compile_context>

<pallas_src>
import functools

import jax
import jax.numpy as jnp
from jax.experimental import pallas as pl
from jax.experimental.pallas import tpu as pltpu


def _round_up(x, m):
    return ((x + m - 1) // m) * m


def _vmem_cap_bytes():
    """Physical VMEM capacity (per TensorCore), conservative fallback."""
    try:
        info = pltpu.get_tpu_info()
        cap = getattr(info, "vmem_capacity_bytes", None)
        if cap:
            return int(cap)
    except Exception:
        pass
    return 64 << 20  # v7x per-TC size: safe lower bound for all generations


def mlp2_kernel(ab_ref, x_ref, w1_ref, b1_ref, w2_ref, b2_ref, o_ref):
    # ab_ref is a (2,) scalar-prefetch array in SMEM: [a, b].
    a = ab_ref[0]
    b = ab_ref[1]

    # First linear layer (MXU matmul, f32 accumulation) + f32 bias broadcast.
    h = jnp.dot(x_ref[...], w1_ref[...],
                preferred_element_type=jnp.float32) + b1_ref[...]

    # LearnableSquare: a*h^2 + b*h == h * (a*h + b)   (2 VPU muls + 1 add, f32).
    # TODO(synk): on v6e/v7x this could run in bf16 if the VALU slot ever
    # saturates; kept f32 so the only bf16 rounding is at the MXU operands.
    h1 = h * (a * h + b)

    # Second linear layer + bias.  Cast h1 to the operand dtype so the bf16
    # path hits the native bf16 MXU; accumulation stays f32.
    y = jnp.dot(h1.astype(w2_ref.dtype), w2_ref[...],
                preferred_element_type=jnp.float32) + b2_ref[...]
    o_ref[...] = y.astype(o_ref.dtype)


def prepare_params(params, *, use_bf16=True):
    """One-time weight prep: pad feature dims to 128-lane multiples and cast.

    Do this ONCE and reuse the result for every forward call so per-call HBM
    traffic is only the activation stream.
    Returns (prepped_dict, (input_sz, hidden_sz, nb_classes)).
    """
    a, b = params["a"], params["b"]
    w1, b1, w2, b2 = params["w1"], params["b1"], params["w2"], params["b2"]

    input_sz, hidden_sz = w1.shape
    nb_classes = w2.shape[1]
    in_p = _round_up(input_sz, 128)
    hid_p = _round_up(hidden_sz, 128)
    out_p = _round_up(nb_classes, 128)

    op_dtype = jnp.bfloat16 if use_bf16 else jnp.float32

    # Zero padding is exact: padded x-cols hit zero w1-rows, padded hidden
    # cols get zero bias (and act(0)=0), padded w2-rows/cols and b2-cols are 0.
    prepped = dict(
        ab=jnp.concatenate([a, b]).astype(jnp.float32),  # (2,) scalar prefetch
        w1=jnp.pad(w1, ((0, in_p - input_sz),
                        (0, hid_p - hidden_sz))).astype(op_dtype),
        b1=jnp.pad(b1, ((0, 0), (0, hid_p - hidden_sz))).astype(jnp.float32),
        w2=jnp.pad(w2, ((0, hid_p - hidden_sz),
                        (0, out_p - nb_classes))).astype(op_dtype),
        b2=jnp.pad(b2, ((0, 0), (0, out_p - nb_classes))).astype(jnp.float32),
    )
    return prepped, (input_sz, hidden_sz, nb_classes)


@functools.partial(
    jax.jit,
    static_argnames=("nb_classes", "block_m", "weight_buffers", "bf16_out"))
def mlp2_forward(x, prepped, nb_classes, *, block_m=512, weight_buffers=1,
                 bf16_out=False):
    """x: (batch, input_sz) f32.  prepped: output of prepare_params()."""
    w1_p, b1_p, w2_p, b2_p, ab = (prepped["w1"], prepped["b1"], prepped["w2"],
                                  prepped["b2"], prepped["ab"])
    in_p, hid_p = w1_p.shape
    out_p = w2_p.shape[1]
    op_dtype = w1_p.dtype
    op_bytes = jnp.dtype(op_dtype).itemsize

    batch, input_sz = x.shape

    # Batch tile: sublane-aligned, capped by block_m.  If the whole (padded)
    # batch would fit in one tile, split it in two so the ("parallel",) batch
    # axis can shard across both v7x TensorCores.
    batch_8 = _round_up(batch, 8)
    tm = min(block_m, batch_8)
    if 8 < batch_8 <= block_m:
        tm = max(8, _round_up((batch_8 + 1) // 2, 8))
    batch_p = _round_up(batch, tm)
    grid = (batch_p // tm,)

    # Only the activations are padded/cast per call.
    x_p = jnp.pad(x, ((0, batch_p - batch),
                      (0, in_p - input_sz))).astype(op_dtype)

    out_dtype = (jnp.bfloat16
                 if (bf16_out and op_dtype == jnp.bfloat16) else jnp.float32)
    out_bytes = jnp.dtype(out_dtype).itemsize

    # Constant-index (VMEM-resident) specs: single-buffered if supported.
    if weight_buffers is None:
        def const_spec(shape):
            return pl.BlockSpec(shape, lambda i, ab: (0, 0))
        w_bufs = 2  # pipeliner default
    else:
        wb = pl.Buffered(buffer_count=weight_buffers)
        def const_spec(shape):
            return pl.BlockSpec(shape, lambda i, ab: (0, 0), pipeline_mode=wb)
        w_bufs = weight_buffers

    # index_maps receive the scalar-prefetch ref as a trailing positional arg.
    in_specs = [
        pl.BlockSpec((tm, in_p), lambda i, ab: (i, 0)),   # x tile (pipelined)
        const_spec((in_p, hid_p)),                        # w1 (resident)
        const_spec((1, hid_p)),                           # b1 (resident)
        const_spec((hid_p, out_p)),                       # w2 (resident)
        const_spec((1, out_p)),                           # b2 (resident)
    ]
    out_spec = pl.BlockSpec((tm, out_p), lambda i, ab: (i, 0))

    # Advisory cost estimate for the XLA scheduler.
    flops = 2 * batch_p * (in_p * hid_p + hid_p * out_p)
    bytes_accessed = (op_bytes * (batch_p * in_p + in_p * hid_p + hid_p * out_p)
                      + 4 * (hid_p + out_p)
                      + out_bytes * batch_p * out_p)
    cost = pl.CostEstimate(flops=flops, transcendentals=0,
                           bytes_accessed=bytes_accessed)

    # VMEM budget matching what the pipeliner allocates:
    #   x / y: 2 buffers each (default double-buffering),
    #   weights/biases: w_bufs buffers each,
    #   + f32 h/h1 temps over the (tm, hid_p) tile.
    vmem_est = (2 * tm * in_p * op_bytes
                + 2 * tm * out_p * out_bytes
                + w_bufs * (in_p * hid_p * op_bytes + hid_p * out_p * op_bytes
                            + 4 * (hid_p + out_p))
                + 2 * tm * hid_p * 4)
    cap = _vmem_cap_bytes()
    vmem_limit = int(min(max(vmem_est + (4 << 20), 32 << 20),
                         int(cap * 0.85)))

    out_arr = pl.pallas_call(
        mlp2_kernel,
        out_shape=jax.ShapeDtypeStruct((batch_p, out_p), out_dtype),
        grid_spec=pltpu.PrefetchScalarGridSpec(
            num_scalar_prefetch=1,
            grid=grid,
            in_specs=in_specs,
            out_specs=out_spec,
        ),
        compiler_params=pltpu.CompilerParams(
            dimension_semantics=("parallel",),
            vmem_limit_bytes=vmem_limit,
        ),
        cost_estimate=cost,
    )(ab, x_p, w1_p, b1_p, w2_p, b2_p)

    return out_arr[:batch, :nb_classes]


def _run_forward(x, prepped, nb_classes):
    """Call the kernel; fall back to default buffering if Buffered(1) is
    rejected by this JAX/Mosaic build."""
    try:
        y = mlp2_forward(x, prepped, nb_classes)
        return jax.block_until_ready(y)
    except Exception:
        y = mlp2_forward(x, prepped, nb_classes, weight_buffers=None)
        return jax.block_until_ready(y)


def init_params(key, input_sz, hidden_sz, nb_classes):
    """Deterministic synthetic parameter init mimicking the module's shapes."""
    ks = jax.random.split(key, 6)
    # nn.Linear stores weight as (out, in); we pre-transpose to (in, out).
    w1 = jax.random.normal(ks[0], (input_sz, hidden_sz), jnp.float32) * 0.1
    b1 = jax.random.normal(ks[1], (1, hidden_sz), jnp.float32) * 0.1
    w2 = jax.random.normal(ks[2], (hidden_sz, nb_classes), jnp.float32) * 0.1
    b2 = jax.random.normal(ks[3], (1, nb_classes), jnp.float32) * 0.1
    a = jax.random.normal(ks[4], (1,), jnp.float32)
    b = jax.random.normal(ks[5], (1,), jnp.float32)
    return dict(a=a, b=b, w1=w1, b1=b1, w2=w2, b2=b2)


def mlp2_ref(x, p):
    """Pure-JAX reference for correctness check."""
    h = x @ p["w1"] + p["b1"]
    h1 = p["a"][0] * h * h + p["b"][0] * h
    return h1 @ p["w2"] + p["b2"]


if __name__ == "__main__":
    key = jax.random.PRNGKey(0)
    k_x, k_p = jax.random.split(key)

    batch, input_sz, hidden_sz, nb_classes = 8, 16, 32, 8
    x = jax.random.normal(k_x, (batch, input_sz), jnp.float32)
    params = init_params(k_p, input_sz, hidden_sz, nb_classes)
    ref = mlp2_ref(x, params)

    # Default throughput path: bf16 MXU operands, f32 accumulation.
    prepped_bf16, (_, _, nc) = prepare_params(params, use_bf16=True)
    out = _run_forward(x, prepped_bf16, nc)
    assert out.shape == (batch, nb_classes)
    assert jnp.allclose(out, ref, atol=5e-2, rtol=5e-2)

    # f32 operand validation path (tight tolerance vs reference).
    prepped_f32, _ = prepare_params(params, use_bf16=False)
    out_f32 = _run_forward(x, prepped_f32, nc)
    assert out_f32.shape == (batch, nb_classes)
    assert jnp.allclose(out_f32, ref, atol=1e-4, rtol=1e-4)

    print("KERNEL_OK")
</pallas_src>

<mosaic_0001>
module attributes {stable_mosaic.version = 11 : i64} {
  func.func @mlp2_kernel(%arg0: i32, %arg1: memref<2xf32, #tpu.memory_space<smem>>, %arg2: memref<8x128xbf16, #tpu.memory_space<vmem>>, %arg3: memref<128x128xbf16, #tpu.memory_space<vmem>>, %arg4: memref<1x128xf32, #tpu.memory_space<vmem>>, %arg5: memref<128x128xbf16, #tpu.memory_space<vmem>>, %arg6: memref<1x128xf32, #tpu.memory_space<vmem>>, %arg7: memref<8x128xf32, #tpu.memory_space<vmem>>) attributes {dimension_semantics = [#tpu.dimension_semantics<parallel>], iteration_bounds = array<i64: 1>, scalar_prefetch = 1 : i64, scratch_operands = 0 : i64, tpu.core_type = #tpu.core_type<tc>, window_params = [{transform_indices = @transform_0, window_bounds = array<i64: 8, 128>}, {pipeline_mode = #tpu.pipeline_mode<synchronous>, transform_indices = @transform_1, window_bounds = array<i64: 128, 128>}, {pipeline_mode = #tpu.pipeline_mode<synchronous>, transform_indices = @transform_2, window_bounds = array<i64: 1, 128>}, {pipeline_mode = #tpu.pipeline_mode<synchronous>, transform_indices = @transform_3, window_bounds = array<i64: 128, 128>}, {pipeline_mode = #tpu.pipeline_mode<synchronous>, transform_indices = @transform_4, window_bounds = array<i64: 1, 128>}, {transform_indices = @transform_5, window_bounds = array<i64: 8, 128>}]} {
    %c0 = arith.constant 0 : index
    %0 = memref.load %arg1[%c0] : memref<2xf32, #tpu.memory_space<smem>>
    %c1 = arith.constant 1 : index
    %1 = memref.load %arg1[%c1] : memref<2xf32, #tpu.memory_space<smem>>
    %c0_0 = arith.constant 0 : index
    %c0_1 = arith.constant 0 : index
    %2 = vector.load %arg2[%c0_0, %c0_1] : memref<8x128xbf16, #tpu.memory_space<vmem>>, vector<8x128xbf16>
    %c0_2 = arith.constant 0 : index
    %c0_3 = arith.constant 0 : index
    %3 = vector.load %arg3[%c0_2, %c0_3] : memref<128x128xbf16, #tpu.memory_space<vmem>>, vector<128x128xbf16>
    %cst = arith.constant dense<0.000000e+00> : vector<8x128xf32>
    %4 = tpu.matmul %2, %3, %cst {dimension_numbers = #tpu.dot_dimension_numbers<[1], [0], [0], [1], [0, 0, 1, 1], [], []>} : vector<8x128xbf16>, vector<128x128xbf16>, vector<8x128xf32> -> vector<8x128xf32>
    %c0_4 = arith.constant 0 : index
    %c0_5 = arith.constant 0 : index
    %5 = vector.load %arg4[%c0_4, %c0_5] : memref<1x128xf32, #tpu.memory_space<vmem>>, vector<1x128xf32>
    %6 = vector.broadcast %5 : vector<1x128xf32> to vector<8x128xf32>
    %7 = arith.addf %4, %6 : vector<8x128xf32>
    %8 = vector.broadcast %0 : f32 to vector<8x128xf32>
    %9 = arith.mulf %8, %7 : vector<8x128xf32>
    %10 = vector.broadcast %1 : f32 to vector<8x128xf32>
    %11 = arith.addf %9, %10 : vector<8x128xf32>
    %12 = arith.mulf %7, %11 : vector<8x128xf32>
    %13 = arith.truncf %12 : vector<8x128xf32> to vector<8x128xbf16>
    %c0_6 = arith.constant 0 : index
    %c0_7 = arith.constant 0 : index
    %14 = vector.load %arg5[%c0_6, %c0_7] : memref<128x128xbf16, #tpu.memory_space<vmem>>, vector<128x128xbf16>
    %cst_8 = arith.constant dense<0.000000e+00> : vector<8x128xf32>
    %15 = tpu.matmul %13, %14, %cst_8 {dimension_numbers = #tpu.dot_dimension_numbers<[1], [0], [0], [1], [0, 0, 1, 1], [], []>} : vector<8x128xbf16>, vector<128x128xbf16>, vector<8x128xf32> -> vector<8x128xf32>
    %c0_9 = arith.constant 0 : index
    %c0_10 = arith.constant 0 : index
    %16 = vector.load %arg6[%c0_9, %c0_10] : memref<1x128xf32, #tpu.memory_space<vmem>>, vector<1x128xf32>
    %17 = vector.broadcast %16 : vector<1x128xf32> to vector<8x128xf32>
    %18 = arith.addf %15, %17 : vector<8x128xf32>
    %c0_11 = arith.constant 0 : index
    %c0_12 = arith.constant 0 : index
    %19 = vector.load %arg7[%c0_11, %c0_12] : memref<8x128xf32, #tpu.memory_space<vmem>>, vector<8x128xf32>
    tpu.vector_store %arg7[%c0_11, %c0_12], %18 {strides = array<i32>} : memref<8x128xf32, #tpu.memory_space<vmem>>, vector<8x128xf32>,
    return
  }
  func.func @transform_0(%arg0: i32, %arg1: memref<2xf32, #tpu.memory_space<smem>>) -> (i32, i32) {
    %c0_i32 = arith.constant 0 : i32
    %c0_i32_0 = arith.constant 0 : i32
    return %arg0, %c0_i32 : i32, i32
  }
  func.func @transform_1(%arg0: i32, %arg1: memref<2xf32, #tpu.memory_space<smem>>) -> (i32, i32) {
    %c0_i32 = arith.constant 0 : i32
    %c0_i32_0 = arith.constant 0 : i32
    %c0_i32_1 = arith.constant 0 : i32
    return %c0_i32, %c0_i32_0 : i32, i32
  }
  func.func @transform_2(%arg0: i32, %arg1: memref<2xf32, #tpu.memory_space<smem>>) -> (i32, i32) {
    %c0_i32 = arith.constant 0 : i32
    %c0_i32_0 = arith.constant 0 : i32
    %c0_i32_1 = arith.constant 0 : i32
    return %c0_i32, %c0_i32_0 : i32, i32
  }
  func.func @transform_3(%arg0: i32, %arg1: memref<2xf32, #tpu.memory_space<smem>>) -> (i32, i32) {
    %c0_i32 = arith.constant 0 : i32
    %c0_i32_0 = arith.constant 0 : i32
    %c0_i32_1 = arith.constant 0 : i32
    return %c0_i32, %c0_i32_0 : i32, i32
  }
  func.func @transform_4(%arg0: i32, %arg1: memref<2xf32, #tpu.memory_space<smem>>) -> (i32, i32) {
    %c0_i32 = arith.constant 0 : i32
    %c0_i32_0 = arith.constant 0 : i32
    %c0_i32_1 = arith.constant 0 : i32
    return %c0_i32, %c0_i32_0 : i32, i32
  }
  func.func @transform_5(%arg0: i32, %arg1: memref<2xf32, #tpu.memory_space<smem>>) -> (i32, i32) {
    %c0_i32 = arith.constant 0 : i32
    %c0_i32_0 = arith.constant 0 : i32
    return %arg0, %c0_i32 : i32, i32
  }
}

module attributes {stable_mosaic.version = 11 : i64} {
  func.func @mlp2_kernel(%arg0: i32, %arg1: memref<2xf32, #tpu.memory_space<smem>>, %arg2: memref<8x128xbf16, #tpu.memory_space<vmem>>, %arg3: memref<128x128xbf16, #tpu.memory_space<vmem>>, %arg4: memref<1x128xf32, #tpu.memory_space<vmem>>, %arg5: memref<128x128xbf16, #tpu.memory_space<vmem>>, %arg6: memref<1x128xf32, #tpu.memory_space<vmem>>, %arg7: memref<8x128xf32, #tpu.memory_space<vmem>>) attributes {dimension_semantics = [#tpu.dimension_semantics<parallel>], iteration_bounds = array<i64: 1>, scalar_prefetch = 1 : i64, scratch_operands = 0 : i64, tpu.core_type = #tpu.core_type<tc>, window_params = [{transform_indices = @transform_0, window_bounds = array<i64: 8, 128>}, {pipeline_mode = #tpu.pipeline_mode<synchronous>, transform_indices = @transform_1, window_bounds = array<i64: 128, 128>}, {pipeline_mode = #tpu.pipeline_mode<synchronous>, transform_indices = @transform_2, window_bounds = array<i64: 1, 128>}, {pipeline_mode = #tpu.pipeline_mode<synchronous>, transform_indices = @transform_3, window_bounds = array<i64: 128, 128>}, {pipeline_mode = #tpu.pipeline_mode<synchronous>, transform_indices = @transform_4, window_bounds = array<i64: 1, 128>}, {transform_indices = @transform_5, window_bounds = array<i64: 8, 128>}]} {
    %c0 = arith.constant 0 : index
    %0 = memref.load %arg1[%c0] : memref<2xf32, #tpu.memory_space<smem>>
    %c1 = arith.constant 1 : index
    %1 = memref.load %arg1[%c1] : memref<2xf32, #tpu.memory_space<smem>>
    %c0_0 = arith.constant 0 : index
    %c0_1 = arith.constant 0 : index
    %2 = vector.load %arg2[%c0_0, %c0_1] : memref<8x128xbf16, #tpu.memory_space<vmem>>, vector<8x128xbf16>
    %c0_2 = arith.constant 0 : index
    %c0_3 = arith.constant 0 : index
    %3 = vector.load %arg3[%c0_2, %c0_3] : memref<128x128xbf16, #tpu.memory_space<vmem>>, vector<128x128xbf16>
    %cst = arith.constant dense<0.000000e+00> : vector<8x128xf32>
    %4 = tpu.matmul %2, %3, %cst {dimension_numbers = #tpu.dot_dimension_numbers<[1], [0], [0], [1], [0, 0, 1, 1], [], []>} : vector<8x128xbf16>, vector<128x128xbf16>, vector<8x128xf32> -> vector<8x128xf32>
    %c0_4 = arith.constant 0 : index
    %c0_5 = arith.constant 0 : index
    %5 = vector.load %arg4[%c0_4, %c0_5] : memref<1x128xf32, #tpu.memory_space<vmem>>, vector<1x128xf32>
    %6 = vector.broadcast %5 : vector<1x128xf32> to vector<8x128xf32>
    %7 = arith.addf %4, %6 : vector<8x128xf32>
    %8 = vector.broadcast %0 : f32 to vector<8x128xf32>
    %9 = arith.mulf %8, %7 : vector<8x128xf32>
    %10 = vector.broadcast %1 : f32 to vector<8x128xf32>
    %11 = arith.addf %9, %10 : vector<8x128xf32>
    %12 = arith.mulf %7, %11 : vector<8x128xf32>
    %13 = arith.truncf %12 : vector<8x128xf32> to vector<8x128xbf16>
    %c0_6 = arith.constant 0 : index
    %c0_7 = arith.constant 0 : index
    %14 = vector.load %arg5[%c0_6, %c0_7] : memref<128x128xbf16, #tpu.memory_space<vmem>>, vector<128x128xbf16>
    %cst_8 = arith.constant dense<0.000000e+00> : vector<8x128xf32>
    %15 = tpu.matmul %13, %14, %cst_8 {dimension_numbers = #tpu.dot_dimension_numbers<[1], [0], [0], [1], [0, 0, 1, 1], [], []>} : vector<8x128xbf16>, vector<128x128xbf16>, vector<8x128xf32> -> vector<8x128xf32>
    %c0_9 = arith.constant 0 : index
    %c0_10 = arith.constant 0 : index
    %16 = vector.load %arg6[%c0_9, %c0_10] : memref<1x128xf32, #tpu.memory_space<vmem>>, vector<1x128xf32>
    %17 = vector.broadcast %16 : vector<1x128xf32> to vector<8x128xf32>
    %18 = arith.addf %15, %17 : vector<8x128xf32>
    %c0_11 = arith.constant 0 : index
    %c0_12 = arith.constant 0 : index
    %19 = vector.load %arg7[%c0_11, %c0_12] : memref<8x128xf32, #tpu.memory_space<vmem>>, vector<8x128xf32>
    tpu.vector_store %arg7[%c0_11, %c0_12], %18 {strides = array<i32>} : memref<8x128xf32, #tpu.memory_space<vmem>>, vector<8x128xf32>,
    return
  }
  func.func @transform_0(%arg0: i32, %arg1: memref<2xf32, #tpu.memory_space<smem>>) -> (i32, i32) {
    %c0_i32 = arith.constant 0 : i32
    %c0_i32_0 = arith.constant 0 : i32
    return %arg0, %c0_i32 : i32, i32
  }
  func.func @transform_1(%arg0: i32, %arg1: memref<2xf32, #tpu.memory_space<smem>>) -> (i32, i32) {
    %c0_i32 = arith.constant 0 : i32
    %c0_i32_0 = arith.constant 0 : i32
    %c0_i32_1 = arith.constant 0 : i32
    return %c0_i32, %c0_i32_0 : i32, i32
  }
  func.func @transform_2(%arg0: i32, %arg1: memref<2xf32, #tpu.memory_space<smem>>) -> (i32, i32) {
    %c0_i32 = arith.constant 0 : i32
    %c0_i32_0 = arith.constant 0 : i32
    %c0_i32_1 = arith.constant 0 : i32
    return %c0_i32, %c0_i32_0 : i32, i32
  }
  func.func @transform_3(%arg0: i32, %arg1: memref<2xf32, #tpu.memory_space<smem>>) -> (i32, i32) {
    %c0_i32 = arith.constant 0 : i32
    %c0_i32_0 = arith.constant 0 : i32
    %c0_i32_1 = arith.constant 0 : i32
    return %c0_i32, %c0_i32_0 : i32, i32
  }
  func.func @transform_4(%arg0: i32, %arg1: memref<2xf32, #tpu.memory_space<smem>>) -> (i32, i32) {
    %c0_i32 = arith.constant 0 : i32
    %c0_i32_0 = arith.constant 0 : i32
    %c0_i32_1 = arith.constant 0 : i32
    return %c0_i32, %c0_i32_0 : i32, i32
  }
  func.func @transform_5(%arg0: i32, %arg1: memref<2xf32, #tpu.memory_space<smem>>) -> (i32, i32) {
    %c0_i32 = arith.constant 0 : i32
    %c0_i32_0 = arith.constant 0 : i32
    return %arg0, %c0_i32 : i32, i32
  }
}

</mosaic_0001>

<bundles_post_ra>
// kernel: mlp2_forward.1
= control target key start
LH: loop header
LB: loop body
LE: loop exit
PB: predicated region body
PF: predicated region fallthrough
CT: control target
= control target key end

     0   :  { %s583_s0 = inlined_call_operand.vmem [shape: f32[2], index: 0, kind: input, shape index: {}]   ;;  %s584_s1 = inlined_call_operand.vmem [shape: bf16[8,128], index: 1, kind: input, shape index: {}]   ;;  %s585_s2 = inlined_call_operand.hbm [shape: bf16[128,128], index: 2, kind: input, shape index: {}]   ;;  %s586_s3 = inlined_call_operand.vmem [shape: f32[1,128], index: 3, kind: input, shape index: {}]   ;;  %s587_s4 = inlined_call_operand.hbm [shape: bf16[128,128], index: 4, kind: input, shape index: {}]   ;;  %s588_s5 = inlined_call_operand.vmem [shape: f32[1,128], index: 5, kind: input, shape index: {}]   ;;  %s589_s6 = inlined_call_operand.hbm [shape: f32[8,128], index: 6, kind: output, shape index: {}]  }
   0x1   :  { %s11_s23 = sshll.u32 %s583_s0, 4  ;;  %s12_s23 = int_to_ptr.vmem [resolvable:$true] %s11_s23 }
   0x2   :  { %s406_s24 = scalar_lea.vmem %s12_s23, 16  ;;  %p411_p1 = scmp.lt.s32.totalorder %s12_s23, %s12_s23 }
   0x3   :  { %p407_p0 = scmp.ne.s32.totalorder %s12_s23, %s406_s24  ;;  %p412_p2 = scmp.lt.s32.totalorder %s406_s24, %s406_s24 }
   0x5   :  { %p413_p3 = por %p412_p2, %p411_p1 }
   0x7   :  { %p414_p4 = pnand %p413_p3, %p407_p0 }
   0x9   :  { %417 = shalt.err (!%p414_p4)  }
   0xa   :  { %s492_s25 = smov [#allocation3]  }
   0xb   :  { %14 = dma.vmem_to_smem %s12_s23, 16, %s492_s25, [#allocation2] }
   0xc   :  { %484 = dma.done.wait [#allocation2], 16 }
   0xd   :  { %485 = vsyncadd [#allocation2], 4294967280 }
   0xe   :  { %16 = sfence }
   0xf   :  { %17 = vsyncpa [#allocation5], 0 }
  0x10   :  { %18 = vsyncpa [#allocation8], 0 }
  0x11   :  { %19 = vsyncpa [#allocation6], 0  ;;  %s493_s26 = smov [#allocation4]   ;;  %s418_s29 = scalar_lea.hbm %s585_s2, 1024 }
  0x12   :  { %s27_s27 = sshll.u32 %s493_s26, 4  ;;  %p419_p5 = scmp.ne.s32.totalorder %s585_s2, %s418_s29  ;;  %s28_s27 = int_to_ptr.vmem [resolvable:$true] %s27_s27 }
  0x13   :  { %p422_p6 = scmp.lt.u32.totalorder %s418_s29, %s585_s2 }
  0x15   :  { %p424_p7 = pnand %p422_p6, %p419_p5 }
  0x17   :  { %427 = shalt.err (!%p424_p7)
}
  0x18   :  { %s428_s10 = scalar_lea.vmem %s28_s27, 1024  ;;  %p433_p9 = scmp.lt.s32.totalorder %s28_s27, %s28_s27 }
  0x19   :  { %p429_p8 = scmp.ne.s32.totalorder %s28_s27, %s428_s10  ;;  %p434_p10 = scmp.lt.s32.totalorder %s428_s10, %s428_s10 }
  0x1b   :  { %p435_p11 = por %p434_p10, %p433_p9 }
  0x1d   :  { %p436_p12 = pnand %p435_p11, %p429_p8 }
  0x1f   :  { %439 = shalt.err (!%p436_p12)
}
  0x20   :  { %s494_s11 = smov 64   ;;  %s495_s12 = smov 4  }
  0x21   :  { %33 = dma.hbm_to_vmem [thread:$0]  %s585_s2, 1024, %s28_s27, [#allocation5], %s494_s11, %s494_s11, %s495_s12  }
  0x22   :  { %s496_s15 = smov [#allocation7]   ;;  %s440_s19 = scalar_lea.hbm %s587_s4, 1024 }
  0x23   :  { %s41_s16 = sshll.u32 %s496_s15, 4  ;;  %p441_p13 = scmp.ne.s32.totalorder %s587_s4, %s440_s19  ;;  %s42_s16 = int_to_ptr.vmem [resolvable:$true] %s41_s16 }
  0x24   :  { %p444_p0 = scmp.lt.u32.totalorder %s440_s19, %s587_s4 }
  0x26   :  { %p446_p1 = pnand %p444_p0, %p441_p13 }
  0x28   :  { %449 = shalt.err (!%p446_p1)
}
  0x29   :  { %s450_s24 = scalar_lea.vmem %s42_s16, 1024  ;;  %p455_p3 = scmp.lt.s32.totalorder %s42_s16, %s42_s16 }
  0x2a   :  { %p451_p2 = scmp.ne.s32.totalorder %s42_s16, %s450_s24  ;;  %p456_p4 = scmp.lt.s32.totalorder %s450_s24, %s450_s24 }
  0x2c   :  { %p457_p5 = por %p456_p4, %p455_p3 }
  0x2e   :  { %p458_p6 = pnand %p457_p5, %p451_p2 }
  0x30   :  { %461 = shalt.err (!%p458_p6)
}
  0x31   :  { %47 = dma.hbm_to_vmem [thread:$0]  %s587_s4, 1024, %s42_s16, [#allocation8], %s494_s11, %s494_s11, %s495_s12  }
  0x32   :  { %486 = dma.done.wait [#allocation5], 1024  }
  0x33   :  { %487 = vsyncadd [#allocation5], 4294966272 }
  0x34   :  { %488 = dma.done.wait [#allocation8], 1024  }
  0x35   :  { %489 = vsyncadd [#allocation8], 4294966272  ;;  %v497_v0 = vmov 0.0   ;;  %vm498_vm0 = vmmov 0   ;;  %v390_v1 = vld [vmem:[#allocation4] sm:$0xff]   ;;  %v391_v2 = vld [vmem:[#allocation4 + $0x8] sm:$0xff]  }
  0x36   :  { %342 = vmatprep.subr.bf16.mxu0 %v497_v0  ;;  %358 = vmatprep.mubr.msk.bf16.mxu0 %vm498_vm0, %v497_v0  ;;  %v392_v3 = vld [vmem:[#allocation4 + $0x10] sm:$0xff]   ;;  %v398_v4 = vld [vmem:[#allocation7] sm:$0xff]   ;;  %v393_v5 = vld [vmem:[#allocation4 + $0x18] sm:$0xff]   ;;  %s57_s27 = sld [smem:[#allocation3]]  ;;  %s305_s0 = sld [smem:[#allocation3 + $0x1]] }
  0x37   :  { %362 = vmatprep.subr.bf16.mxu1 %v497_v0  ;;  %378 = vmatprep.mubr.msk.bf16.mxu1 %vm498_vm0, %v497_v0  ;;  %v399_v6 = vld [vmem:[#allocation7 + $0x8] sm:$0xff]   ;;  %v394_v7 = vld [vmem:[#allocation4 + $0x20] sm:$0xff]   ;;  %v400_v8 = vld [vmem:[#allocation7 + $0x10] sm:$0xff]   ;;  %s499_s7 = smov [#allocation9]  }
  0x38   :  { %343 = vmatpush3.bf16.msra.mxu0 %v390_v1  ;;  %363 = vmatpush3.bf16.msra.mxu1 %v398_v4  ;;  %v395_v9 = vld [vmem:[#allocation4 + $0x28] sm:$0xff]   ;;  %v401_v10 = vld [vmem:[#allocation7 + $0x18] sm:$0xff]   ;;  %v396_v11 = vld [vmem:[#allocation4 + $0x30] sm:$0xff]   ;;  %s295_s8 = sshll.u32 %s499_s7, 4  ;;  %s296_s8 = int_to_ptr.vmem [resolvable:$true] %s295_s8 }
  0x39   :  { %344 = vmatprep.subr.bf16.mxu0 %v497_v0  ;;  %364 = vmatprep.subr.bf16.mxu1 %v497_v0  ;;  %v402_v12 = vld [vmem:[#allocation7 + $0x20] sm:$0xff]   ;;  %v397_v13 = vld [vmem:[#allocation4 + $0x38] sm:$0xff]   ;;  %v403_v15 = vld [vmem:[#allocation7 + $0x28] sm:$0xff]   ;;  %p467_p8 = scmp.lt.s32.totalorder %s296_s8, %s296_s8 }
  0x3a   :  { %v59_v14 = vld [vmem:[%s584_s1] sm:$0xf]  ;;  %v404_v16 = vld [vmem:[#allocation7 + $0x30] sm:$0xff]   ;;  %v405_v17 = vld [vmem:[#allocation7 + $0x38] sm:$0xff]  }
  0x3b   :  { %v306_v18 = vld [vmem:[%s586_s3] ss:$0 sm:$0xff]  ;;  %s462_s3 = scalar_lea.vmem %s296_s8, 128 }
  0x3c   :  { %345 = vmatpush3.bf16.msra.mxu0 %v391_v2  ;;  %365 = vmatpush3.bf16.msra.mxu1 %v399_v6  ;;  %v171_v20 = vstv %s57_s27  ;;  %v173_v23 = vstv %s305_s0  ;;  %v315_v30 = vld [vmem:[%s588_s5] ss:$0 sm:$0xff]  ;;  %p463_p7 = scmp.ne.s32.totalorder %s296_s8, %s462_s3  ;;  %p468_p9 = scmp.lt.s32.totalorder %s462_s3, %s462_s3 }
  0x3d   :  { %346 = vmatprep.subr.bf16.mxu0 %v497_v0  ;;  %366 = vmatprep.subr.bf16.mxu1 %v497_v0 }
  0x3e   :  { %p469_p10 = por %p468_p9, %p467_p8 }
  0x40   :  { %347 = vmatpush3.bf16.msra.mxu0 %v392_v3  ;;  %367 = vmatpush3.bf16.msra.mxu1 %v400_v8  ;;  %p470_p11 = pnand %p469_p10, %p463_p7 }
  0x41   :  { %348 = vmatprep.subr.bf16.mxu0 %v497_v0  ;;  %368 = vmatprep.subr.bf16.mxu1 %v497_v0 }
  0x44   :  { %349 = vmatpush3.bf16.msra.mxu0 %v393_v5  ;;  %369 = vmatpush3.bf16.msra.mxu1 %v401_v10 }
  0x45   :  { %350 = vmatprep.subr.bf16.mxu0 %v497_v0  ;;  %370 = vmatprep.subr.bf16.mxu1 %v497_v0 }
  0x48   :  { %351 = vmatpush3.bf16.msra.mxu0 %v394_v7  ;;  %371 = vmatpush3.bf16.msra.mxu1 %v402_v12 }
  0x49   :  { %352 = vmatprep.subr.bf16.mxu0 %v497_v0  ;;  %372 = vmatprep.subr.bf16.mxu1 %v497_v0 }
  0x4c   :  { %353 = vmatpush3.bf16.msra.mxu0 %v395_v9  ;;  %373 = vmatpush3.bf16.msra.mxu1 %v403_v15 }
  0x4d   :  { %354 = vmatprep.subr.bf16.mxu0 %v497_v0  ;;  %374 = vmatprep.subr.bf16.mxu1 %v497_v0 }
  0x50   :  { %355 = vmatpush3.bf16.msra.mxu0 %v396_v11  ;;  %375 = vmatpush3.bf16.msra.mxu1 %v404_v16 }
  0x51   :  { %356 = vmatprep.subr.bf16.mxu0 %v497_v0  ;;  %376 = vmatprep.subr.bf16.mxu1 %v497_v0 }
  0x54   :  { %357 = vmatpush3.bf16.msra.mxu0 %v397_v13  ;;  %377 = vmatpush3.bf16.msra.mxu1 %v405_v17 }
  0x57   :  { %359 = vmatmul.mubr.bf16.vlgmr.msra.gmra.mrb[0].mxu0 %v59_v14 }
 0x12a   :  { %v165_v19 = vpop.f32.mrb[0].mxu0 }
 0x12b   :  { %v166_v21 = vadd.f32 %v306_v18, %v165_v19  ;;  %v360_v22 = vpop.f32.mrb[1].mxu0 }
 0x12c   :  { %v168_v24 = vpop.f32.mrb[2].mxu0 }
 0x12d   :  { %v172_v25 = vmul.f32 %v171_v20, %v166_v21  ;;  %v361_v26 = vpop.f32.mrb[3].mxu0 }
 0x12f   :  { %v174_v27 = vadd.f32 %v173_v23, %v172_v25 }
 0x131   :  { %v175_v28 = vmul.f32 %v174_v27, %v166_v21 }
 0x133   :  { %v176_v29 = vpack.c.bf16 %v175_v28, %v175_v28 }
 0x135   :  { %379 = vmatmul.mubr.bf16.vlgmr.msra.gmra.mrb[0].mxu1 %v176_v29 }
 0x208   :  { %v282_v31 = vpop.f32.mrb[0].mxu1 }
 0x209   :  { %v283_v32 = vadd.f32 %v315_v30, %v282_v31  ;;  %v380_v33 = vpop.f32.mrb[1].mxu1 }
 0x20a   :  { %v285_v34 = vpop.f32.mrb[2].mxu1 }
 0x20b   :  { %288 = vst [vmem:[#allocation9] sm:$0xff] %v283_v32  ;;  %v381_v35 = vpop.f32.mrb[3].mxu1 }
 0x20c   :  { %473 = shalt.err (!%p470_p11)
}
 0x20d   :  { %s474_s5 = scalar_lea.hbm %s589_s6, 128 }
 0x20e   :  { %p475_p12 = scmp.ne.s32.totalorder %s589_s6, %s474_s5  ;;  %p478_p13 = scmp.lt.u32.totalorder %s474_s5, %s589_s6 }
 0x210   :  { %p480_p0 = pnand %p478_p13, %p475_p12 }
 0x212   :  { %483 = shalt.err (!%p480_p0)
}
 0x213   :  { %298 = dma.vmem_to_hbm [thread:$0]  %s296_s8, 128, %s589_s6, [#allocation6]  }
 0x214   :  { %490 = dma.done.wait [#allocation6], 128  }
 0x215   :  { %491 = vsyncadd [#allocation6], 4294967168 }
 0x216   :  { %302 = vsyncpa [#allocation5], 1 }
 0x217   :  { %303 = vsyncpa [#allocation8], 1 }
 0x218   :  { %304 = vsyncpa [#allocation6], 1 }

// kernel: mlp2_forward.1
= control target key start
LH: loop header
LB: loop body
LE: loop exit
PB: predicated region body
PF: predicated region fallthrough
CT: control target
= control target key end

     0   :  { %s583_s0 = inlined_call_operand.vmem [shape: f32[2], index: 0, kind: input, shape index: {}]   ;;  %s584_s1 = inlined_call_operand.vmem [shape: bf16[8,128], index: 1, kind: input, shape index: {}]   ;;  %s585_s2 = inlined_call_operand.hbm [shape: bf16[128,128], index: 2, kind: input, shape index: {}]   ;;  %s586_s3 = inlined_call_operand.vmem [shape: f32[1,128], index: 3, kind: input, shape index: {}]   ;;  %s587_s4 = inlined_call_operand.hbm [shape: bf16[128,128], index: 4, kind: input, shape index: {}]   ;;  %s588_s5 = inlined_call_operand.vmem [shape: f32[1,128], index: 5, kind: input, shape index: {}]   ;;  %s589_s6 = inlined_call_operand.hbm [shape: f32[8,128], index: 6, kind: output, shape index: {}]  }
   0x1   :  { %s11_s23 = sshll.u32 %s583_s0, 4  ;;  %s12_s23 = int_to_ptr.vmem [resolvable:$true] %s11_s23 }
   0x2   :  { %s406_s24 = scalar_lea.vmem %s12_s23, 16  ;;  %p411_p1 = scmp.lt.s32.totalorder %s12_s23, %s12_s23 }
   0x3   :  { %p407_p0 = scmp.ne.s32.totalorder %s12_s23, %s406_s24  ;;  %p412_p2 = scmp.lt.s32.totalorder %s406_s24, %s406_s24 }
   0x5   :  { %p413_p3 = por %p412_p2, %p411_p1 }
   0x7   :  { %p414_p4 = pnand %p413_p3, %p407_p0 }
   0x9   :  { %417 = shalt.err (!%p414_p4)  }
   0xa   :  { %s492_s25 = smov [#allocation3]  }
   0xb   :  { %14 = dma.vmem_to_smem %s12_s23, 16, %s492_s25, [#allocation2] }
   0xc   :  { %484 = dma.done.wait [#allocation2], 16 }
   0xd   :  { %485 = vsyncadd [#allocation2], 4294967280 }
   0xe   :  { %16 = sfence }
   0xf   :  { %17 = vsyncpa [#allocation5], 0 }
  0x10   :  { %18 = vsyncpa [#allocation8], 0 }
  0x11   :  { %19 = vsyncpa [#allocation6], 0  ;;  %s493_s26 = smov [#allocation4]   ;;  %s418_s29 = scalar_lea.hbm %s585_s2, 1024 }
  0x12   :  { %s27_s27 = sshll.u32 %s493_s26, 4  ;;  %p419_p5 = scmp.ne.s32.totalorder %s585_s2, %s418_s29  ;;  %s28_s27 = int_to_ptr.vmem [resolvable:$true] %s27_s27 }
  0x13   :  { %p422_p6 = scmp.lt.u32.totalorder %s418_s29, %s585_s2 }
  0x15   :  { %p424_p7 = pnand %p422_p6, %p419_p5 }
  0x17   :  { %427 = shalt.err (!%p424_p7)
}
  0x18   :  { %s428_s10 = scalar_lea.vmem %s28_s27, 1024  ;;  %p433_p9 = scmp.lt.s32.totalorder %s28_s27, %s28_s27 }
  0x19   :  { %p429_p8 = scmp.ne.s32.totalorder %s28_s27, %s428_s10  ;;  %p434_p10 = scmp.lt.s32.totalorder %s428_s10, %s428_s10 }
  0x1b   :  { %p435_p11 = por %p434_p10, %p433_p9 }
  0x1d   :  { %p436_p12 = pnand %p435_p11, %p429_p8 }
  0x1f   :  { %439 = shalt.err (!%p436_p12)
}
  0x20   :  { %s494_s11 = smov 64   ;;  %s495_s12 = smov 4  }
  0x21   :  { %33 = dma.hbm_to_vmem [thread:$0]  %s585_s2, 1024, %s28_s27, [#allocation5], %s494_s11, %s494_s11, %s495_s12  }
  0x22   :  { %s496_s15 = smov [#allocation7]   ;;  %s440_s19 = scalar_lea.hbm %s587_s4, 1024 }
  0x23   :  { %s41_s16 = sshll.u32 %s496_s15, 4  ;;  %p441_p13 = scmp.ne.s32.totalorder %s587_s4, %s440_s19  ;;  %s42_s16 = int_to_ptr.vmem [resolvable:$true] %s41_s16 }
  0x24   :  { %p444_p0 = scmp.lt.u32.totalorder %s440_s19, %s587_s4 }
  0x26   :  { %p446_p1 = pnand %p444_p0, %p441_p13 }
  0x28   :  { %449 = shalt.err (!%p446_p1)
}
  0x29   :  { %s450_s24 = scalar_lea.vmem %s42_s16, 1024  ;;  %p455_p3 = scmp.lt.s32.totalorder %s42_s16, %s42_s16 }
  0x2a   :  { %p451_p2 = scmp.ne.s32.totalorder %s42_s16, %s450_s24  ;;  %p456_p4 = scmp.lt.s32.totalorder %s450_s24, %s450_s24 }
  0x2c   :  { %p457_p5 = por %p456_p4, %p455_p3 }
  0x2e   :  { %p458_p6 = pnand %p457_p5, %p451_p2 }
  0x30   :  { %461 = shalt.err (!%p458_p6)
}
  0x31   :  { %47 = dma.hbm_to_vmem [thread:$0]  %s587_s4, 1024, %s42_s16, [#allocation8], %s494_s11, %s494_s11, %s495_s12  }
  0x32   :  { %486 = dma.done.wait [#allocation5], 1024  }
  0x33   :  { %487 = vsyncadd [#allocation5], 4294966272 }
  0x34   :  { %488 = dma.done.wait [#allocation8], 1024  }
  0x35   :  { %489 = vsyncadd [#allocation8], 4294966272  ;;  %v497_v0 = vmov 0.0   ;;  %vm498_vm0 = vmmov 0   ;;  %v390_v1 = vld [vmem:[#allocation4] sm:$0xff]   ;;  %v391_v2 = vld [vmem:[#allocation4 + $0x8] sm:$0xff]  }
  0x36   :  { %342 = vmatprep.subr.bf16.mxu0 %v497_v0  ;;  %358 = vmatprep.mubr.msk.bf16.mxu0 %vm498_vm0, %v497_v0  ;;  %v392_v3 = vld [vmem:[#allocation4 + $0x10] sm:$0xff]   ;;  %v398_v4 = vld [vmem:[#allocation7] sm:$0xff]   ;;  %v393_v5 = vld [vmem:[#allocation4 + $0x18] sm:$0xff]   ;;  %s57_s27 = sld [smem:[#allocation3]]  ;;  %s305_s0 = sld [smem:[#allocation3 + $0x1]] }
  0x37   :  { %362 = vmatprep.subr.bf16.mxu1 %v497_v0  ;;  %378 = vmatprep.mubr.msk.bf16.mxu1 %vm498_vm0, %v497_v0  ;;  %v399_v6 = vld [vmem:[#allocation7 + $0x8] sm:$0xff]   ;;  %v394_v7 = vld [vmem:[#allocation4 + $0x20] sm:$0xff]   ;;  %v400_v8 = vld [vmem:[#allocation7 + $0x10] sm:$0xff]   ;;  %s499_s7 = smov [#allocation9]  }
  0x38   :  { %343 = vmatpush3.bf16.msra.mxu0 %v390_v1  ;;  %363 = vmatpush3.bf16.msra.mxu1 %v398_v4  ;;  %v395_v9 = vld [vmem:[#allocation4 + $0x28] sm:$0xff]   ;;  %v401_v10 = vld [vmem:[#allocation7 + $0x18] sm:$0xff]   ;;  %v396_v11 = vld [vmem:[#allocation4 + $0x30] sm:$0xff]   ;;  %s295_s8 = sshll.u32 %s499_s7, 4  ;;  %s296_s8 = int_to_ptr.vmem [resolvable:$true] %s295_s8 }
  0x39   :  { %344 = vmatprep.subr.bf16.mxu0 %v497_v0  ;;  %364 = vmatprep.subr.bf16.mxu1 %v497_v0  ;;  %v402_v12 = vld [vmem:[#allocation7 + $0x20] sm:$0xff]   ;;  %v397_v13 = vld [vmem:[#allocation4 + $0x38] sm:$0xff]   ;;  %v403_v15 = vld [vmem:[#allocation7 + $0x28] sm:$0xff]   ;;  %p467_p8 = scmp.lt.s32.totalorder %s296_s8, %s296_s8 }
  0x3a   :  { %v59_v14 = vld [vmem:[%s584_s1] sm:$0xf]  ;;  %v404_v16 = vld [vmem:[#allocation7 + $0x30] sm:$0xff]   ;;  %v405_v17 = vld [vmem:[#allocation7 + $0x38] sm:$0xff]  }
  0x3b   :  { %v306_v18 = vld [vmem:[%s586_s3] ss:$0 sm:$0xff]  ;;  %s462_s3 = scalar_lea.vmem %s296_s8, 128 }
  0x3c   :  { %345 = vmatpush3.bf16.msra.mxu0 %v391_v2  ;;  %365 = vmatpush3.bf16.msra.mxu1 %v399_v6  ;;  %v171_v20 = vstv %s57_s27  ;;  %v173_v23 = vstv %s305_s0  ;;  %v315_v30 = vld [vmem:[%s588_s5] ss:$0 sm:$0xff]  ;;  %p463_p7 = scmp.ne.s32.totalorder %s296_s8, %s462_s3  ;;  %p468_p9 = scmp.lt.s32.totalorder %s462_s3, %s462_s3 }
  0x3d   :  { %346 = vmatprep.subr.bf16.mxu0 %v497_v0  ;;  %366 = vmatprep.subr.bf16.mxu1 %v497_v0 }
  0x3e   :  { %p469_p10 = por %p468_p9, %p467_p8 }
  0x40   :  { %347 = vmatpush3.bf16.msra.mxu0 %v392_v3  ;;  %367 = vmatpush3.bf16.msra.mxu1 %v400_v8  ;;  %p470_p11 = pnand %p469_p10, %p463_p7 }
  0x41   :  { %348 = vmatprep.subr.bf16.mxu0 %v497_v0  ;;  %368 = vmatprep.subr.bf16.mxu1 %v497_v0 }
  0x44   :  { %349 = vmatpush3.bf16.msra.mxu0 %v393_v5  ;;  %369 = vmatpush3.bf16.msra.mxu1 %v401_v10 }
  0x45   :  { %350 = vmatprep.subr.bf16.mxu0 %v497_v0  ;;  %370 = vmatprep.subr.bf16.mxu1 %v497_v0 }
  0x48   :  { %351 = vmatpush3.bf16.msra.mxu0 %v394_v7  ;;  %371 = vmatpush3.bf16.msra.mxu1 %v402_v12 }
  0x49   :  { %352 = vmatprep.subr.bf16.mxu0 %v497_v0  ;;  %372 = vmatprep.subr.bf16.mxu1 %v497_v0 }
  0x4c   :  { %353 = vmatpush3.bf16.msra.mxu0 %v395_v9  ;;  %373 = vmatpush3.bf16.msra.mxu1 %v403_v15 }
  0x4d   :  { %354 = vmatprep.subr.bf16.mxu0 %v497_v0  ;;  %374 = vmatprep.subr.bf16.mxu1 %v497_v0 }
  0x50   :  { %355 = vmatpush3.bf16.msra.mxu0 %v396_v11  ;;  %375 = vmatpush3.bf16.msra.mxu1 %v404_v16 }
  0x51   :  { %356 = vmatprep.subr.bf16.mxu0 %v497_v0  ;;  %376 = vmatprep.subr.bf16.mxu1 %v497_v0 }
  0x54   :  { %357 = vmatpush3.bf16.msra.mxu0 %v397_v13  ;;  %377 = vmatpush3.bf16.msra.mxu1 %v405_v17 }
  0x57   :  { %359 = vmatmul.mubr.bf16.vlgmr.msra.gmra.mrb[0].mxu0 %v59_v14 }
 0x12a   :  { %v165_v19 = vpop.f32.mrb[0].mxu0 }
 0x12b   :  { %v166_v21 = vadd.f32 %v306_v18, %v165_v19  ;;  %v360_v22 = vpop.f32.mrb[1].mxu0 }
 0x12c   :  { %v168_v24 = vpop.f32.mrb[2].mxu0 }
 0x12d   :  { %v172_v25 = vmul.f32 %v171_v20, %v166_v21  ;;  %v361_v26 = vpop.f32.mrb[3].mxu0 }
 0x12f   :  { %v174_v27 = vadd.f32 %v173_v23, %v172_v25 }
 0x131   :  { %v175_v28 = vmul.f32 %v174_v27, %v166_v21 }
 0x133   :  { %v176_v29 = vpack.c.bf16 %v175_v28, %v175_v28 }
 0x135   :  { %379 = vmatmul.mubr.bf16.vlgmr.msra.gmra.mrb[0].mxu1 %v176_v29 }
 0x208   :  { %v282_v31 = vpop.f32.mrb[0].mxu1 }
 0x209   :  { %v283_v32 = vadd.f32 %v315_v30, %v282_v31  ;;  %v380_v33 = vpop.f32.mrb[1].mxu1 }
 0x20a   :  { %v285_v34 = vpop.f32.mrb[2].mxu1 }
 0x20b   :  { %288 = vst [vmem:[#allocation9] sm:$0xff] %v283_v32  ;;  %v381_v35 = vpop.f32.mrb[3].mxu1 }
 0x20c   :  { %473 = shalt.err (!%p470_p11)
}
 0x20d   :  { %s474_s5 = scalar_lea.hbm %s589_s6, 128 }
 0x20e   :  { %p475_p12 = scmp.ne.s32.totalorder %s589_s6, %s474_s5  ;;  %p478_p13 = scmp.lt.u32.totalorder %s474_s5, %s589_s6 }
 0x210   :  { %p480_p0 = pnand %p478_p13, %p475_p12 }
 0x212   :  { %483 = shalt.err (!%p480_p0)
}
 0x213   :  { %298 = dma.vmem_to_hbm [thread:$0]  %s296_s8, 128, %s589_s6, [#allocation6]  }
 0x214   :  { %490 = dma.done.wait [#allocation6], 128  }
 0x215   :  { %491 = vsyncadd [#allocation6], 4294967168 }
 0x216   :  { %302 = vsyncpa [#allocation5], 1 }
 0x217   :  { %303 = vsyncpa [#allocation8], 1 }
 0x218   :  { %304 = vsyncpa [#allocation6], 1 }

</bundles_post_ra>
